<compile_context>
chip_gen: v7x
topology: tpu7x:2x2x1
jax: 0.10.0
libtpu: 0.0.40
codegen_flags: <defaults>
</compile_context>

<pallas_src>
from collections import namedtuple

import jax
import jax.numpy as jnp
import numpy as np
from jax.experimental import pallas as pl
from jax.experimental.pallas import tpu as pltpu

ModelOutput = namedtuple(
    "ModelOutput",
    ["vertices", "joints", "full_pose", "betas", "transl", "global_orient", "hand_pose"],
)

NUM_JOINTS = 16          # 1 global + 15 hand joints
NUM_BETAS = 10
NUM_PCA = 6
NUM_POSE_BASIS = (NUM_JOINTS - 1) * 9  # 135
NUM_FEAT = NUM_BETAS + NUM_POSE_BASIS  # 145
# MANO kinematic tree (kintree_table[0] with parents[0] = -1)
MANO_PARENTS = [-1, 0, 1, 2, 0, 4, 5, 0, 7, 8, 0, 10, 11, 0, 13, 14]


# ----------------------------------------------------------------------------
# Fused Pallas kernel: blend shapes + pose correctives + LBS skinning
# ----------------------------------------------------------------------------
def _mano_kernel(feat_ref, a_ref, tr_ref, dirs_ref, vt_ref, w_ref, out_ref):
    # feat_ref : (TB, 145)    f32   [betas | pose_feature]
    # a_ref    : (12, TB, 16) f32   a_ref[4*r + c][b, j] = A_rel[b, j, r, c]
    # tr_ref   : (TB, 3)      f32   translation
    # dirs_ref : (145, 3V)    bf16  [shapedirs ; posedirs], coordinate-major lanes
    # vt_ref   : (1, 3V)      f32   v_template, coordinate-major
    # w_ref    : (16, V)      f32   lbs_weights^T
    # out_ref  : (TB, 3V)     f32   skinned vertices + transl, coordinate-major
    V = w_ref.shape[1]
    dirs = dirs_ref[...]
    feat = feat_ref[...].astype(dirs.dtype)
    # Blend shapes + pose correctives in one MXU push; coordinate-major lanes.
    vp = jnp.dot(feat, dirs, preferred_element_type=jnp.float32) + vt_ref[...]
    w = w_ref[...]
    # Free lane slices of the posed vertices: x / y / z slabs of shape (TB, V).
    vxyz = [vp[:, c * V:(c + 1) * V] for c in range(3)]
    for r in range(3):  # output coordinate = row r of the blended 3x4 transform
        # Blended translation column (homogeneous coordinate is 1).
        acc = jnp.dot(a_ref[4 * r + 3], w, preferred_element_type=jnp.float32)
        for c in range(3):  # rotation columns
            t_rc = jnp.dot(a_ref[4 * r + c], w, preferred_element_type=jnp.float32)
            acc = acc + t_rc * vxyz[c]
        out_ref[:, r * V:(r + 1) * V] = acc + tr_ref[:, r:r + 1]


def _batch_tile(B):
    # Block size over the batch: keeps second-minor block dims either a
    # multiple of 8 or the full extent, and always divides B exactly.
    if B <= 8 or B % 8 != 0:
        return B
    return 8


def mano_skin(feat, a12, transl, dirs_cm, v_template_cm, lbs_weights_T):
    B, K = feat.shape
    V3 = dirs_cm.shape[1]
    J, V = lbs_weights_T.shape
    TB = _batch_tile(B)
    return pl.pallas_call(
        _mano_kernel,
        grid=(B // TB,),
        in_specs=[
            pl.BlockSpec((TB, K), lambda i: (i, 0)),
            pl.BlockSpec((12, TB, J), lambda i: (0, i, 0)),
            pl.BlockSpec((TB, 3), lambda i: (i, 0)),
            pl.BlockSpec((K, V3), lambda i: (0, 0)),   # weights stay resident
            pl.BlockSpec((1, V3), lambda i: (0, 0)),
            pl.BlockSpec((J, V), lambda i: (0, 0)),
        ],
        out_specs=pl.BlockSpec((TB, V3), lambda i: (i, 0)),
        out_shape=jax.ShapeDtypeStruct((B, V3), jnp.float32),
        compiler_params=pltpu.CompilerParams(
            dimension_semantics=("parallel",)),
    )(feat, a12, transl, dirs_cm, v_template_cm, lbs_weights_T)


# ----------------------------------------------------------------------------
# Small JAX glue (faithful ports of the PyTorch helpers)
# ----------------------------------------------------------------------------
def batch_rodrigues_jax(rot_vecs):
    angle = jnp.linalg.norm(rot_vecs + 1e-8, axis=1, keepdims=True)   # (N,1)
    rot_dir = rot_vecs / angle
    cos = jnp.cos(angle)[:, None]                                     # (N,1,1)
    sin = jnp.sin(angle)[:, None]
    rx, ry, rz = rot_dir[:, 0:1], rot_dir[:, 1:2], rot_dir[:, 2:3]
    zeros = jnp.zeros_like(rx)
    K = jnp.concatenate(
        [zeros, -rz, ry, rz, zeros, -rx, -ry, rx, zeros], axis=1
    ).reshape(-1, 3, 3)
    ident = jnp.eye(3, dtype=rot_vecs.dtype)[None]
    return ident + sin * K + (1.0 - cos) * jnp.matmul(K, K)


def batch_rigid_transform_jax(rot_mats, joints, parents):
    B, J = joints.shape[:2]
    joints = joints[..., None]                                        # (B,J,3,1)
    parent_idx = np.asarray(parents[1:], dtype=np.int32)
    rel_joints = joints.at[:, 1:].add(-joints[:, parent_idx])
    top = jnp.concatenate([rot_mats, rel_joints], axis=-1)            # (B,J,3,4)
    bot = jnp.broadcast_to(jnp.array([0.0, 0.0, 0.0, 1.0], jnp.float32),
                           (B, J, 1, 4))
    tmats = jnp.concatenate([top, bot], axis=-2)                      # (B,J,4,4)
    chain = [tmats[:, 0]]
    for i in range(1, J):
        chain.append(jnp.matmul(chain[int(parents[i])], tmats[:, i]))
    transforms = jnp.stack(chain, axis=1)                             # (B,J,4,4)
    posed_joints = transforms[:, :, :3, 3]
    joints_h = jnp.concatenate(
        [joints, jnp.zeros((B, J, 1, 1), jnp.float32)], axis=2)
    tj = jnp.matmul(transforms, joints_h)                             # (B,J,4,1)
    pad_tj = jnp.concatenate(
        [jnp.zeros((B, J, 4, 3), jnp.float32), tj], axis=-1)
    rel_transforms = transforms - pad_tj
    return posed_joints, rel_transforms


# ----------------------------------------------------------------------------
# MANO forward (Pallas-backed); wrap in jax.jit at the call site.
# ----------------------------------------------------------------------------
def mano_forward(params, betas, global_orient, hand_pose, transl):
    B = betas.shape[0]
    # PCA pose projection + mean pose (tiny, kept as JAX glue)
    hand_pose_full = hand_pose @ params["hand_components"]            # (B,45)
    full_pose = jnp.concatenate([global_orient, hand_pose_full], axis=1)
    full_pose = full_pose + params["pose_mean"]                       # (B,48)

    rot_mats = batch_rodrigues_jax(full_pose.reshape(-1, 3)).reshape(
        B, NUM_JOINTS, 3, 3)
    ident = jnp.eye(3, dtype=jnp.float32)
    pose_feature = (rot_mats[:, 1:] - ident).reshape(B, -1)           # (B,135)
    feat = jnp.concatenate([betas, pose_feature], axis=1)             # (B,145)

    # Joint regression folded onto betas (exact linear refactor of
    # J_regressor @ (v_template + blend_shapes)); tiny (B,10)@(10,48).
    J = params["j_template"][None] + jnp.einsum(
        "bk,kjc->bjc", betas, params["j_dirs"])                       # (B,16,3)

    # Rigid transform chain over 16 joints (sequential 4x4 matmuls, JAX glue)
    J_transformed, A = batch_rigid_transform_jax(rot_mats, J, MANO_PARENTS)
    # (12, B, 16): leading index = 4*r + c of the 3x4 relative transforms.
    A12 = jnp.transpose(A[:, :, :3, :], (2, 3, 0, 1)).reshape(12, B, NUM_JOINTS)

    # Fused Pallas kernel: blend + skin + translation, coordinate-major output.
    V = params["lbs_weights_T"].shape[1]
    verts_cm = mano_skin(feat, A12, transl, params["dirs_cm"],
                         params["v_template_cm"], params["lbs_weights_T"])
    vertices = jnp.transpose(verts_cm.reshape(B, 3, V), (0, 2, 1))    # (B,V,3)
    joints = J_transformed + transl[:, None, :]

    return ModelOutput(vertices=vertices, joints=joints, full_pose=full_pose,
                       betas=betas, transl=transl, global_orient=global_orient,
                       hand_pose=hand_pose_full)


# ----------------------------------------------------------------------------
# Deterministic synthetic parameters (shapes follow the MANO constructor;
# V is reduced to 256 for a small test — no .pkl/.npz is loaded).
# For real MANO (V=778), pad V up to a multiple of 128 (e.g. 896) in these
# precomputed weights to keep lane-dense, unmasked stores.
# ----------------------------------------------------------------------------
def make_params(key, V=256, dirs_dtype=jnp.bfloat16):
    keys = jax.random.split(key, 7)
    v_template = jax.random.normal(keys[0], (V, 3), jnp.float32) * 0.1
    shapedirs = jax.random.normal(keys[1], (V, 3, NUM_BETAS), jnp.float32) * 0.01
    posedirs = jax.random.normal(keys[2], (NUM_POSE_BASIS, V * 3), jnp.float32) * 0.01
    jreg = jax.random.uniform(keys[3], (NUM_JOINTS, V), jnp.float32)
    jreg = jreg / jreg.sum(axis=1, keepdims=True)
    lbs_w = jax.nn.softmax(
        jax.random.normal(keys[4], (V, NUM_JOINTS), jnp.float32) * 2.0, axis=1)
    hand_components = jax.random.normal(keys[5], (NUM_PCA, 45), jnp.float32) * 0.5
    hand_mean = jax.random.normal(keys[6], (45,), jnp.float32) * 0.1
    pose_mean = jnp.concatenate([jnp.zeros(3, jnp.float32), hand_mean])

    # Coordinate-major (index = c*V + v) re-layouts of the blend weights.
    shapedirs_cm = jnp.transpose(shapedirs, (2, 1, 0)).reshape(NUM_BETAS, 3 * V)
    posedirs_cm = jnp.transpose(
        posedirs.reshape(NUM_POSE_BASIS, V, 3), (0, 2, 1)).reshape(NUM_POSE_BASIS, 3 * V)
    # Single fused weight for [betas | pose_feature] @ dirs ; bf16 (f32 accum in-kernel).
    dirs_cm = jnp.concatenate([shapedirs_cm, posedirs_cm], axis=0).astype(dirs_dtype)
    v_template_cm = v_template.T.reshape(1, 3 * V)

    # Joint regression folded onto betas (exact linear refactor, kept f32):
    #   J = J_regressor @ v_shaped = j_template + betas @ j_dirs
    j_template = jreg @ v_template                                    # (16, 3)
    j_dirs = jnp.einsum("jv,vck->kjc", jreg, shapedirs)               # (10, 16, 3)

    params = {
        "dirs_cm": dirs_cm,                     # (145, 3V) bf16
        "v_template_cm": v_template_cm,         # (1, 3V)   f32
        "j_template": j_template,               # (16, 3)   f32
        "j_dirs": j_dirs,                       # (10,16,3) f32
        # lbs weights kept f32: they sum to 1 and directly scale the transforms,
        # so bf16 here would eat most of the verification tolerance.
        "lbs_weights_T": lbs_w.T,               # (16, V)   f32
        "hand_components": hand_components,     # (6, 45)
        "pose_mean": pose_mean,                 # (48,)
    }
    raw = {
        "v_template": v_template, "shapedirs": shapedirs, "posedirs": posedirs,
        "J_regressor": jreg, "lbs_weights": lbs_w,
        "hand_components": hand_components, "pose_mean": pose_mean,
    }
    return params, raw


# ----------------------------------------------------------------------------
# Pure-JAX reference (mirrors the PyTorch lbs) for a correctness check
# ----------------------------------------------------------------------------
def lbs_ref(betas, pose, v_template, shapedirs, posedirs, J_regressor,
            parents, lbs_weights):
    B = betas.shape[0]
    v_shaped = v_template[None] + jnp.einsum("bl,mkl->bmk", betas, shapedirs)
    J = jnp.einsum("bik,ji->bjk", v_shaped, J_regressor)
    rot_mats = batch_rodrigues_jax(pose.reshape(-1, 3)).reshape(B, -1, 3, 3)
    pose_feature = (rot_mats[:, 1:] - jnp.eye(3, dtype=jnp.float32)).reshape(B, -1)
    pose_offsets = (pose_feature @ posedirs).reshape(B, -1, 3)
    v_posed = pose_offsets + v_shaped
    J_transformed, A = batch_rigid_transform_jax(rot_mats, J, parents)
    W = jnp.broadcast_to(lbs_weights[None], (B,) + lbs_weights.shape)
    T = jnp.matmul(W, A.reshape(B, NUM_JOINTS, 16)).reshape(B, -1, 4, 4)
    homo = jnp.ones((B, v_posed.shape[1], 1), jnp.float32)
    v_posed_h = jnp.concatenate([v_posed, homo], axis=2)
    v_homo = jnp.matmul(T, v_posed_h[..., None])
    return v_homo[:, :, :3, 0], J_transformed


if __name__ == "__main__":
    B, V = 2, 256
    key = jax.random.PRNGKey(0)
    pkey, ikey = jax.random.split(key)
    params, raw = make_params(pkey, V)

    k1, k2, k3, k4 = jax.random.split(ikey, 4)
    betas = jax.random.normal(k1, (B, NUM_BETAS), jnp.float32) * 0.1
    global_orient = jax.random.normal(k2, (B, 3), jnp.float32) * 0.3
    hand_pose = jax.random.normal(k3, (B, NUM_PCA), jnp.float32) * 0.3
    transl = jax.random.normal(k4, (B, 3), jnp.float32) * 0.05

    fwd = jax.jit(mano_forward)
    out = fwd(params, betas, global_orient, hand_pose, transl)
    out = jax.block_until_ready(out)

    # Reference check (pure JAX f32, mirroring the PyTorch forward)
    hp_full = hand_pose @ raw["hand_components"]
    full_pose = jnp.concatenate([global_orient, hp_full], axis=1) + raw["pose_mean"]
    v_ref, j_ref = lbs_ref(betas, full_pose, raw["v_template"], raw["shapedirs"],
                           raw["posedirs"], raw["J_regressor"], MANO_PARENTS,
                           raw["lbs_weights"])
    v_ref = v_ref + transl[:, None, :]
    j_ref = j_ref + transl[:, None, :]

    assert out.vertices.shape == (B, V, 3)
    assert out.joints.shape == (B, NUM_JOINTS, 3)
    # bf16 blend weights dominate the error (expected max ~5e-4 at these scales)
    np.testing.assert_allclose(np.asarray(out.vertices), np.asarray(v_ref),
                               rtol=3e-3, atol=3e-3)
    np.testing.assert_allclose(np.asarray(out.joints), np.asarray(j_ref),
                               rtol=3e-3, atol=3e-3)
    print("KERNEL_OK")
</pallas_src>

<mosaic_0001>
module attributes {stable_mosaic.version = 11 : i64} {
  func.func @_mano_kernel(%arg0: i32, %arg1: memref<2x145xf32, #tpu.memory_space<vmem>>, %arg2: memref<12x2x16xf32, #tpu.memory_space<vmem>>, %arg3: memref<2x3xf32, #tpu.memory_space<vmem>>, %arg4: memref<145x768xbf16, #tpu.memory_space<vmem>>, %arg5: memref<1x768xf32, #tpu.memory_space<vmem>>, %arg6: memref<16x256xf32, #tpu.memory_space<vmem>>, %arg7: memref<2x768xf32, #tpu.memory_space<vmem>>) attributes {dimension_semantics = [#tpu.dimension_semantics<parallel>], iteration_bounds = array<i64: 1>, scalar_prefetch = 0 : i64, scratch_operands = 0 : i64, tpu.core_type = #tpu.core_type<tc>, window_params = [{transform_indices = @transform_0, window_bounds = array<i64: 2, 145>}, {transform_indices = @transform_1, window_bounds = array<i64: 12, 2, 16>}, {transform_indices = @transform_2, window_bounds = array<i64: 2, 3>}, {pipeline_mode = #tpu.pipeline_mode<synchronous>, transform_indices = @transform_3, window_bounds = array<i64: 145, 768>}, {pipeline_mode = #tpu.pipeline_mode<synchronous>, transform_indices = @transform_4, window_bounds = array<i64: 1, 768>}, {pipeline_mode = #tpu.pipeline_mode<synchronous>, transform_indices = @transform_5, window_bounds = array<i64: 16, 256>}, {transform_indices = @transform_6, window_bounds = array<i64: 2, 768>}]} {
    %c0 = arith.constant 0 : index
    %c0_0 = arith.constant 0 : index
    %0 = vector.load %arg4[%c0, %c0_0] : memref<145x768xbf16, #tpu.memory_space<vmem>>, vector<145x768xbf16>
    %c0_1 = arith.constant 0 : index
    %c0_2 = arith.constant 0 : index
    %1 = vector.load %arg1[%c0_1, %c0_2] : memref<2x145xf32, #tpu.memory_space<vmem>>, vector<2x145xf32>
    %2 = arith.truncf %1 : vector<2x145xf32> to vector<2x145xbf16>
    %cst = arith.constant dense<0.000000e+00> : vector<2x768xf32>
    %3 = tpu.matmul %2, %0, %cst {dimension_numbers = #tpu.dot_dimension_numbers<[1], [0], [0], [1], [0, 0, 1, 1], [], []>} : vector<2x145xbf16>, vector<145x768xbf16>, vector<2x768xf32> -> vector<2x768xf32>
    %c0_3 = arith.constant 0 : index
    %c0_4 = arith.constant 0 : index
    %4 = vector.load %arg5[%c0_3, %c0_4] : memref<1x768xf32, #tpu.memory_space<vmem>>, vector<1x768xf32>
    %5 = vector.broadcast %4 : vector<1x768xf32> to vector<2x768xf32>
    %6 = arith.addf %3, %5 : vector<2x768xf32>
    %c0_5 = arith.constant 0 : index
    %c0_6 = arith.constant 0 : index
    %7 = vector.load %arg6[%c0_5, %c0_6] : memref<16x256xf32, #tpu.memory_space<vmem>>, vector<16x256xf32>
    %8 = vector.extract_strided_slice %6 {offsets = [0, 0], sizes = [2, 256], strides = [1, 1]} : vector<2x768xf32> to vector<2x256xf32>
    %9 = vector.extract_strided_slice %6 {offsets = [0, 256], sizes = [2, 256], strides = [1, 1]} : vector<2x768xf32> to vector<2x256xf32>
    %10 = vector.extract_strided_slice %6 {offsets = [0, 512], sizes = [2, 256], strides = [1, 1]} : vector<2x768xf32> to vector<2x256xf32>
    %c3 = arith.constant 3 : index
    %c0_7 = arith.constant 0 : index
    %c0_8 = arith.constant 0 : index
    %11 = vector.load %arg2[%c3, %c0_7, %c0_8] : memref<12x2x16xf32, #tpu.memory_space<vmem>>, vector<1x2x16xf32>
    %12 = vector.shape_cast %11 : vector<1x2x16xf32> to vector<2x16xf32>
    %cst_9 = arith.constant dense<0.000000e+00> : vector<2x256xf32>
    %13 = tpu.matmul %12, %7, %cst_9 {dimension_numbers = #tpu.dot_dimension_numbers<[1], [0], [0], [1], [0, 0, 1, 1], [], []>} : vector<2x16xf32>, vector<16x256xf32>, vector<2x256xf32> -> vector<2x256xf32>
    %c0_10 = arith.constant 0 : index
    %c0_11 = arith.constant 0 : index
    %c0_12 = arith.constant 0 : index
    %14 = vector.load %arg2[%c0_10, %c0_11, %c0_12] : memref<12x2x16xf32, #tpu.memory_space<vmem>>, vector<1x2x16xf32>
    %15 = vector.shape_cast %14 : vector<1x2x16xf32> to vector<2x16xf32>
    %cst_13 = arith.constant dense<0.000000e+00> : vector<2x256xf32>
    %16 = tpu.matmul %15, %7, %cst_13 {dimension_numbers = #tpu.dot_dimension_numbers<[1], [0], [0], [1], [0, 0, 1, 1], [], []>} : vector<2x16xf32>, vector<16x256xf32>, vector<2x256xf32> -> vector<2x256xf32>
    %17 = arith.mulf %16, %8 : vector<2x256xf32>
    %18 = arith.addf %13, %17 : vector<2x256xf32>
    %c1 = arith.constant 1 : index
    %c0_14 = arith.constant 0 : index
    %c0_15 = arith.constant 0 : index
    %19 = vector.load %arg2[%c1, %c0_14, %c0_15] : memref<12x2x16xf32, #tpu.memory_space<vmem>>, vector<1x2x16xf32>
    %20 = vector.shape_cast %19 : vector<1x2x16xf32> to vector<2x16xf32>
    %cst_16 = arith.constant dense<0.000000e+00> : vector<2x256xf32>
    %21 = tpu.matmul %20, %7, %cst_16 {dimension_numbers = #tpu.dot_dimension_numbers<[1], [0], [0], [1], [0, 0, 1, 1], [], []>} : vector<2x16xf32>, vector<16x256xf32>, vector<2x256xf32> -> vector<2x256xf32>
    %22 = arith.mulf %21, %9 : vector<2x256xf32>
    %23 = arith.addf %18, %22 : vector<2x256xf32>
    %c2 = arith.constant 2 : index
    %c0_17 = arith.constant 0 : index
    %c0_18 = arith.constant 0 : index
    %24 = vector.load %arg2[%c2, %c0_17, %c0_18] : memref<12x2x16xf32, #tpu.memory_space<vmem>>, vector<1x2x16xf32>
    %25 = vector.shape_cast %24 : vector<1x2x16xf32> to vector<2x16xf32>
    %cst_19 = arith.constant dense<0.000000e+00> : vector<2x256xf32>
    %26 = tpu.matmul %25, %7, %cst_19 {dimension_numbers = #tpu.dot_dimension_numbers<[1], [0], [0], [1], [0, 0, 1, 1], [], []>} : vector<2x16xf32>, vector<16x256xf32>, vector<2x256xf32> -> vector<2x256xf32>
    %27 = arith.mulf %26, %10 : vector<2x256xf32>
    %28 = arith.addf %23, %27 : vector<2x256xf32>
    %c0_20 = arith.constant 0 : index
    %c0_21 = arith.constant 0 : index
    %29 = vector.load %arg3[%c0_20, %c0_21] : memref<2x3xf32, #tpu.memory_space<vmem>>, vector<2x1xf32>
    %30 = vector.broadcast %29 : vector<2x1xf32> to vector<2x256xf32>
    %31 = arith.addf %28, %30 : vector<2x256xf32>
    %c0_22 = arith.constant 0 : index
    %c0_23 = arith.constant 0 : index
    %32 = vector.load %arg7[%c0_22, %c0_23] : memref<2x768xf32, #tpu.memory_space<vmem>>, vector<2x256xf32>
    tpu.vector_store %arg7[%c0_22, %c0_23], %31 {strides = array<i32>} : memref<2x768xf32, #tpu.memory_space<vmem>>, vector<2x256xf32>,
    %c7 = arith.constant 7 : index
    %c0_24 = arith.constant 0 : index
    %c0_25 = arith.constant 0 : index
    %33 = vector.load %arg2[%c7, %c0_24, %c0_25] : memref<12x2x16xf32, #tpu.memory_space<vmem>>, vector<1x2x16xf32>
    %34 = vector.shape_cast %33 : vector<1x2x16xf32> to vector<2x16xf32>
    %cst_26 = arith.constant dense<0.000000e+00> : vector<2x256xf32>
    %35 = tpu.matmul %34, %7, %cst_26 {dimension_numbers = #tpu.dot_dimension_numbers<[1], [0], [0], [1], [0, 0, 1, 1], [], []>} : vector<2x16xf32>, vector<16x256xf32>, vector<2x256xf32> -> vector<2x256xf32>
    %c4 = arith.constant 4 : index
    %c0_27 = arith.constant 0 : index
    %c0_28 = arith.constant 0 : index
    %36 = vector.load %arg2[%c4, %c0_27, %c0_28] : memref<12x2x16xf32, #tpu.memory_space<vmem>>, vector<1x2x16xf32>
    %37 = vector.shape_cast %36 : vector<1x2x16xf32> to vector<2x16xf32>
    %cst_29 = arith.constant dense<0.000000e+00> : vector<2x256xf32>
    %38 = tpu.matmul %37, %7, %cst_29 {dimension_numbers = #tpu.dot_dimension_numbers<[1], [0], [0], [1], [0, 0, 1, 1], [], []>} : vector<2x16xf32>, vector<16x256xf32>, vector<2x256xf32> -> vector<2x256xf32>
    %39 = arith.mulf %38, %8 : vector<2x256xf32>
    %40 = arith.addf %35, %39 : vector<2x256xf32>
    %c5 = arith.constant 5 : index
    %c0_30 = arith.constant 0 : index
    %c0_31 = arith.constant 0 : index
    %41 = vector.load %arg2[%c5, %c0_30, %c0_31] : memref<12x2x16xf32, #tpu.memory_space<vmem>>, vector<1x2x16xf32>
    %42 = vector.shape_cast %41 : vector<1x2x16xf32> to vector<2x16xf32>
    %cst_32 = arith.constant dense<0.000000e+00> : vector<2x256xf32>
    %43 = tpu.matmul %42, %7, %cst_32 {dimension_numbers = #tpu.dot_dimension_numbers<[1], [0], [0], [1], [0, 0, 1, 1], [], []>} : vector<2x16xf32>, vector<16x256xf32>, vector<2x256xf32> -> vector<2x256xf32>
    %44 = arith.mulf %43, %9 : vector<2x256xf32>
    %45 = arith.addf %40, %44 : vector<2x256xf32>
    %c6 = arith.constant 6 : index
    %c0_33 = arith.constant 0 : index
    %c0_34 = arith.constant 0 : index
    %46 = vector.load %arg2[%c6, %c0_33, %c0_34] : memref<12x2x16xf32, #tpu.memory_space<vmem>>, vector<1x2x16xf32>
    %47 = vector.shape_cast %46 : vector<1x2x16xf32> to vector<2x16xf32>
    %cst_35 = arith.constant dense<0.000000e+00> : vector<2x256xf32>
    %48 = tpu.matmul %47, %7, %cst_35 {dimension_numbers = #tpu.dot_dimension_numbers<[1], [0], [0], [1], [0, 0, 1, 1], [], []>} : vector<2x16xf32>, vector<16x256xf32>, vector<2x256xf32> -> vector<2x256xf32>
    %49 = arith.mulf %48, %10 : vector<2x256xf32>
    %50 = arith.addf %45, %49 : vector<2x256xf32>
    %c0_36 = arith.constant 0 : index
    %c1_37 = arith.constant 1 : index
    %51 = vector.load %arg3[%c0_36, %c1_37] : memref<2x3xf32, #tpu.memory_space<vmem>>, vector<2x1xf32>
    %52 = vector.broadcast %51 : vector<2x1xf32> to vector<2x256xf32>
    %53 = arith.addf %50, %52 : vector<2x256xf32>
    %c0_38 = arith.constant 0 : index
    %c256 = arith.constant 256 : index
    %54 = vector.load %arg7[%c0_38, %c256] : memref<2x768xf32, #tpu.memory_space<vmem>>, vector<2x256xf32>
    tpu.vector_store %arg7[%c0_38, %c256], %53 {strides = array<i32>} : memref<2x768xf32, #tpu.memory_space<vmem>>, vector<2x256xf32>,
    %c11 = arith.constant 11 : index
    %c0_39 = arith.constant 0 : index
    %c0_40 = arith.constant 0 : index
    %55 = vector.load %arg2[%c11, %c0_39, %c0_40] : memref<12x2x16xf32, #tpu.memory_space<vmem>>, vector<1x2x16xf32>
    %56 = vector.shape_cast %55 : vector<1x2x16xf32> to vector<2x16xf32>
    %cst_41 = arith.constant dense<0.000000e+00> : vector<2x256xf32>
    %57 = tpu.matmul %56, %7, %cst_41 {dimension_numbers = #tpu.dot_dimension_numbers<[1], [0], [0], [1], [0, 0, 1, 1], [], []>} : vector<2x16xf32>, vector<16x256xf32>, vector<2x256xf32> -> vector<2x256xf32>
    %c8 = arith.constant 8 : index
    %c0_42 = arith.constant 0 : index
    %c0_43 = arith.constant 0 : index
    %58 = vector.load %arg2[%c8, %c0_42, %c0_43] : memref<12x2x16xf32, #tpu.memory_space<vmem>>, vector<1x2x16xf32>
    %59 = vector.shape_cast %58 : vector<1x2x16xf32> to vector<2x16xf32>
    %cst_44 = arith.constant dense<0.000000e+00> : vector<2x256xf32>
    %60 = tpu.matmul %59, %7, %cst_44 {dimension_numbers = #tpu.dot_dimension_numbers<[1], [0], [0], [1], [0, 0, 1, 1], [], []>} : vector<2x16xf32>, vector<16x256xf32>, vector<2x256xf32> -> vector<2x256xf32>
    %61 = arith.mulf %60, %8 : vector<2x256xf32>
    %62 = arith.addf %57, %61 : vector<2x256xf32>
    %c9 = arith.constant 9 : index
    %c0_45 = arith.constant 0 : index
    %c0_46 = arith.constant 0 : index
    %63 = vector.load %arg2[%c9, %c0_45, %c0_46] : memref<12x2x16xf32, #tpu.memory_space<vmem>>, vector<1x2x16xf32>
    %64 = vector.shape_cast %63 : vector<1x2x16xf32> to vector<2x16xf32>
    %cst_47 = arith.constant dense<0.000000e+00> : vector<2x256xf32>
    %65 = tpu.matmul %64, %7, %cst_47 {dimension_numbers = #tpu.dot_dimension_numbers<[1], [0], [0], [1], [0, 0, 1, 1], [], []>} : vector<2x16xf32>, vector<16x256xf32>, vector<2x256xf32> -> vector<2x256xf32>
    %66 = arith.mulf %65, %9 : vector<2x256xf32>
    %67 = arith.addf %62, %66 : vector<2x256xf32>
    %c10 = arith.constant 10 : index
    %c0_48 = arith.constant 0 : index
    %c0_49 = arith.constant 0 : index
    %68 = vector.load %arg2[%c10, %c0_48, %c0_49] : memref<12x2x16xf32, #tpu.memory_space<vmem>>, vector<1x2x16xf32>
    %69 = vector.shape_cast %68 : vector<1x2x16xf32> to vector<2x16xf32>
    %cst_50 = arith.constant dense<0.000000e+00> : vector<2x256xf32>
    %70 = tpu.matmul %69, %7, %cst_50 {dimension_numbers = #tpu.dot_dimension_numbers<[1], [0], [0], [1], [0, 0, 1, 1], [], []>} : vector<2x16xf32>, vector<16x256xf32>, vector<2x256xf32> -> vector<2x256xf32>
    %71 = arith.mulf %70, %10 : vector<2x256xf32>
    %72 = arith.addf %67, %71 : vector<2x256xf32>
    %c0_51 = arith.constant 0 : index
    %c2_52 = arith.constant 2 : index
    %73 = vector.load %arg3[%c0_51, %c2_52] : memref<2x3xf32, #tpu.memory_space<vmem>>, vector<2x1xf32>
    %74 = vector.broadcast %73 : vector<2x1xf32> to vector<2x256xf32>
    %75 = arith.addf %72, %74 : vector<2x256xf32>
    %c0_53 = arith.constant 0 : index
    %c512 = arith.constant 512 : index
    %76 = vector.load %arg7[%c0_53, %c512] : memref<2x768xf32, #tpu.memory_space<vmem>>, vector<2x256xf32>
    tpu.vector_store %arg7[%c0_53, %c512], %75 {strides = array<i32>} : memref<2x768xf32, #tpu.memory_space<vmem>>, vector<2x256xf32>,
    return
  }
  func.func @transform_0(%arg0: i32) -> (i32, i32) {
    %c0_i32 = arith.constant 0 : i32
    %c0_i32_0 = arith.constant 0 : i32
    return %arg0, %c0_i32 : i32, i32
  }
  func.func @transform_1(%arg0: i32) -> (i32, i32, i32) {
    %c0_i32 = arith.constant 0 : i32
    %c0_i32_0 = arith.constant 0 : i32
    %c0_i32_1 = arith.constant 0 : i32
    return %c0_i32, %arg0, %c0_i32_0 : i32, i32, i32
  }
  func.func @transform_2(%arg0: i32) -> (i32, i32) {
    %c0_i32 = arith.constant 0 : i32
    %c0_i32_0 = arith.constant 0 : i32
    return %arg0, %c0_i32 : i32, i32
  }
  func.func @transform_3(%arg0: i32) -> (i32, i32) {
    %c0_i32 = arith.constant 0 : i32
    %c0_i32_0 = arith.constant 0 : i32
    %c0_i32_1 = arith.constant 0 : i32
    return %c0_i32, %c0_i32_0 : i32, i32
  }
  func.func @transform_4(%arg0: i32) -> (i32, i32) {
    %c0_i32 = arith.constant 0 : i32
    %c0_i32_0 = arith.constant 0 : i32
    %c0_i32_1 = arith.constant 0 : i32
    return %c0_i32, %c0_i32_0 : i32, i32
  }
  func.func @transform_5(%arg0: i32) -> (i32, i32) {
    %c0_i32 = arith.constant 0 : i32
    %c0_i32_0 = arith.constant 0 : i32
    %c0_i32_1 = arith.constant 0 : i32
    return %c0_i32, %c0_i32_0 : i32, i32
  }
  func.func @transform_6(%arg0: i32) -> (i32, i32) {
    %c0_i32 = arith.constant 0 : i32
    %c0_i32_0 = arith.constant 0 : i32
    return %arg0, %c0_i32 : i32, i32
  }
}

</mosaic_0001>

<bundles_post_ra>
// kernel: mano_forward.1
= control target key start
LH: loop header
LB: loop body
LE: loop exit
PB: predicated region body
PF: predicated region fallthrough
CT: control target
= control target key end

     0   :  { %v1803_v1 = vmov 0   ;;  %v1804_v5 = vmov 2   ;;  %vm416_vm0 = vcmask 1040384   ;;  %vm412_vm1 = vcmask 138240   ;;  %s2162_s3 = inlined_call_operand.vmem [shape: bf16[145,768], index: 3, kind: input, shape index: {}]   ;;  %s2163_s0 = inlined_call_operand.vmem [shape: f32[2,145], index: 0, kind: input, shape index: {}]   ;;  %s2164_s5 = inlined_call_operand.vmem [shape: f32[16,256], index: 5, kind: input, shape index: {}]   ;;  %s2165_s2 = inlined_call_operand.vmem [shape: f32[2,3], index: 2, kind: input, shape index: {}]   ;;  %s2166_s1 = inlined_call_operand.vmem [shape: f32[12,2,16], index: 1, kind: input, shape index: {}]   ;;  %s2167_s4 = inlined_call_operand.vmem [shape: f32[1,768], index: 4, kind: input, shape index: {}]   ;;  %s2168_s6 = inlined_call_operand.vmem [shape: f32[2,768], index: 6, kind: output, shape index: {}]  }
   0x1   :  { %v1716_v0 = vld [vmem:[%s2162_s3 + $0x4] ss:$24 sps:$4 sm:$0xff]   ;;  %1712 = vset.pattern.permute.xlu0 %v1803_v1  ;;  %v1720_v3 = vld [vmem:[%s2162_s3] ss:$24 sps:$4 sm:$0xff]   ;;  %1714 = vset.pattern.permute.xlu1 %v1804_v5  ;;  %v1722_v6 = vld [vmem:[%s2162_s3 + $0x34] ss:$24 sps:$4 sm:$0xff]  }
   0x2   :  { %v1718_v2 = vld [vmem:[%s2162_s3 + $0xc] ss:$24 sps:$4 sm:$0xff]   ;;  %437 = vmatprep.subr.bf16.mxu0 %v1716_v0  ;;  %v1721_v4 = vld [vmem:[%s2162_s3 + $0x8] ss:$24 sps:$4 sm:$0xff]   ;;  %v1724_v7 = vld [vmem:[%s2162_s3 + $0x3c] ss:$24 sps:$4 sm:$0xff]  }
   0x3   :  { %478 = vmatprep.subr.bf16.mxu1 %v1718_v2  ;;  %438 = vmatpush1.bf16.msra.mxu0 %v1720_v3  ;;  %v1726_v8 = vld [vmem:[%s2162_s3 + $0x30] ss:$24 sps:$4 sm:$0xff]   ;;  %v1728_v10 = vld [vmem:[%s2162_s3 + $0x64] ss:$24 sps:$4 sm:$0xff]   ;;  %v1732_v12 = vld [vmem:[%s2162_s3 + $0x60] ss:$24 sps:$4 sm:$0xff]  }
   0x4   :  { %479 = vmatpush1.bf16.msra.mxu1 %v1721_v4  ;;  %439 = vmatprep.subr.bf16.mxu0 %v1722_v6  ;;  %v1727_v9 = vld [vmem:[%s2162_s3 + $0x38] ss:$24 sps:$4 sm:$0xff]   ;;  %v1730_v11 = vld [vmem:[%s2162_s3 + $0x6c] ss:$24 sps:$4 sm:$0xff]   ;;  %v1733_v13 = vld [vmem:[%s2162_s3 + $0x68] ss:$24 sps:$4 sm:$0xff]  }
   0x5   :  { %480 = vmatprep.subr.bf16.mxu1 %v1724_v7  ;;  %v1734_v14 = vld [vmem:[%s2162_s3 + $0x94] ss:$24 sps:$4 sm:$0xff]   ;;  %v1738_v16 = vld [vmem:[%s2162_s3 + $0x90] ss:$24 sps:$4 sm:$0xff]   ;;  %v1740_v18 = vld [vmem:[%s2162_s3 + $0xc4] ss:$24 sps:$4 sm:$0xff]  }
   0x6   :  { %v1736_v15 = vld [vmem:[%s2162_s3 + $0x9c] ss:$24 sps:$4 sm:$0xff]   ;;  %v1739_v17 = vld [vmem:[%s2162_s3 + $0x98] ss:$24 sps:$4 sm:$0xff]   ;;  %v1742_v19 = vld [vmem:[%s2162_s3 + $0xcc] ss:$24 sps:$4 sm:$0xff]  }
   0x7   :  { %440 = vmatpush1.bf16.msra.mxu0 %v1726_v8  ;;  %v1744_v20 = vld [vmem:[%s2162_s3 + $0xc0] ss:$24 sps:$4 sm:$0xff]   ;;  %v1746_v22 = vld [vmem:[%s2162_s3 + $0xf4] ss:$24 sps:$4 sm:$0xff]   ;;  %v1750_v24 = vld [vmem:[%s2162_s3 + $0xf0] ss:$24 sps:$4 sm:$0xff]  }
   0x8   :  { %481 = vmatpush1.bf16.msra.mxu1 %v1727_v9  ;;  %441 = vmatprep.subr.bf16.mxu0 %v1728_v10  ;;  %v1745_v21 = vld [vmem:[%s2162_s3 + $0xc8] ss:$24 sps:$4 sm:$0xff]   ;;  %v1748_v23 = vld [vmem:[%s2162_s3 + $0xfc] ss:$24 sps:$4 sm:$0xff]   ;;  %v1751_v25 = vld [vmem:[%s2162_s3 + $0xf8] ss:$24 sps:$4 sm:$0xff]  }
   0x9   :  { %482 = vmatprep.subr.bf16.mxu1 %v1730_v11  ;;  %v1752_v26 = vld [vmem:[%s2162_s3 + $0x124] ss:$24 sps:$4 sm:$0xff]   ;;  %v1756_v28 = vld [vmem:[%s2162_s3 + $0x120] ss:$24 sps:$4 sm:$0xff]   ;;  %v1758_v30 = vld [vmem:[%s2162_s3 + $0x154] ss:$24 sps:$4 sm:$0xff]  }
   0xa   :  { %v1754_v27 = vld [vmem:[%s2162_s3 + $0x12c] ss:$24 sps:$4 sm:$0xff]   ;;  %v1757_v29 = vld [vmem:[%s2162_s3 + $0x128] ss:$24 sps:$4 sm:$0xff]   ;;  %v1760_v31 = vld [vmem:[%s2162_s3 + $0x15c] ss:$24 sps:$4 sm:$0xff]  }
   0xb   :  { %442 = vmatpush1.bf16.msra.mxu0 %v1732_v12  ;;  %v1570_v32 = vld.sshfl [vmem:[%s2163_s0] sm:$0x33 pattern:$0x76325410]  ;;  %v78_v33 = vld [vmem:[%s2162_s3 + $0x1b0] sm:$0x11] }
   0xc   :  { %483 = vmatpush1.bf16.msra.mxu1 %v1733_v13  ;;  %443 = vmatprep.subr.bf16.mxu0 %v1734_v14  ;;  %v79_v34 = vld [vmem:[%s2162_s3 + $0x1b8] sm:$0x11]  ;;  %v90_v35 = vcombine.high %v1570_v32, %v1570_v32  ;;  %v1762_v36 = vld [vmem:[%s2162_s3 + $0x150] ss:$24 sps:$4 sm:$0xff]   ;;  %v1766_v40 = vld [vmem:[%s2162_s3 + $0x18c] ss:$24 sps:$4 sm:$0xff]   ;;  %v1626_v41 = vcombine.high %v78_v33, %v78_v33  ;;  %v1625_v46 = vcombine.low %v78_v33, %v78_v33 }
   0xd   :  { %484 = vmatprep.subr.bf16.mxu1 %v1736_v15  ;;  %v1763_v37 = vld [vmem:[%s2162_s3 + $0x158] ss:$24 sps:$4 sm:$0xff]   ;;  %v1764_v38 = vld [vmem:[%s2162_s3 + $0x184] ss:$24 sps:$4 sm:$0xff]   ;;  %v1628_v42 = vcombine.high %v79_v34, %v79_v34  ;;  %v1956_v43 = vsel %vm416_vm0, 65535, %v1803_v1  ;;  %v1627_v47 = vcombine.low %v79_v34, %v79_v34  ;;  %v561_v50 = vld [vmem:[%s2164_s5 + $0x8] sm:$0xff]  ;;  %v1987_v58 = vpack.c.bf16 %v1570_v32, %v1570_v32 }
   0xe   :  { %v94_v39 = vpack.c.bf16 %v90_v35, %v90_v35  ;;  %v1768_v44 = vld [vmem:[%s2162_s3 + $0x180] ss:$24 sps:$4 sm:$0xff]   ;;  %v423_v48 = vand.u32 %v1626_v41, %v1956_v43  ;;  %v420_v52 = vand.u32 %v1625_v46, %v1956_v43  ;;  %v1776_v54 = vld [vmem:[%s2162_s3 + $0x14] ss:$24 sps:$4 sm:$0xff]   ;;  %v1774_v59 = vld [vmem:[%s2162_s3 + $0x10] ss:$24 sps:$4 sm:$0xff]   ;;  %v97_v35 = vlaneseq }
   0xf   :  { %444 = vmatpush1.bf16.msra.mxu0 %v1738_v16  ;;  %v1769_v45 = vld [vmem:[%s2162_s3 + $0x188] ss:$24 sps:$4 sm:$0xff]   ;;  %v429_v49 = vand.u32 %v1628_v42, %v1956_v43  ;;  %v563_v51 = vld [vmem:[%s2164_s5 + $0x18] sm:$0xff]  ;;  %v426_v53 = vand.u32 %v1627_v47, %v1956_v43  ;;  %v562_v57 = vld [vmem:[%s2164_s5 + $0x10] sm:$0xff]  ;;  %v1805_v1 = vmov 0.0   ;;  %vm567_vm2 = vcmask 130048  }
  0x10   :  { %485 = vmatpush1.bf16.msra.mxu1 %v1739_v17  ;;  %445 = vmatprep.subr.bf16.mxu0 %v1740_v18  ;;  %v560_v55 = vld [vmem:[%s2164_s5] sm:$0xff]  ;;  %v1982_v56 = vpack.c.bf16 %v563_v51, %v561_v50  ;;  %v1782_v2 = vld [vmem:[%s2162_s3 + $0x74] ss:$24 sps:$4 sm:$0xff]   ;;  %v1780_v3 = vld [vmem:[%s2162_s3 + $0x70] ss:$24 sps:$4 sm:$0xff]   ;;  %v1806_v7 = vmov 1  }
  0x11   :  { %486 = vmatprep.subr.bf16.mxu1 %v1742_v19  ;;  %1631 = vmatprep.mubr.msk.bf16.mxu0 %vm412_vm1, %v94_v39  ;;  %v1992_v60 = vpack.c.bf16 %v562_v57, %v560_v55  ;;  %v1779_v61 = vld [vmem:[%s2162_s3 + $0x44] ss:$24 sps:$4 sm:$0xff]   ;;  %v1777_v62 = vld [vmem:[%s2162_s3 + $0x40] ss:$24 sps:$4 sm:$0xff]   ;;  %v1788_v11 = vld [vmem:[%s2162_s3 + $0xd4] ss:$24 sps:$4 sm:$0xff]  }
  0x12   :  { %1632 = vmatprep.mubr.msk.bf16.mxu1 %vm412_vm1, %v94_v39  ;;  %v878_v63 = vld [vmem:[%s2165_s2] sm:$0x3]  ;;  %v1785_v6 = vld [vmem:[%s2162_s3 + $0xa4] ss:$24 sps:$4 sm:$0xff]   ;;  %v1786_v12 = vld [vmem:[%s2162_s3 + $0xd0] ss:$24 sps:$4 sm:$0xff]  }
  0x13   :  { %446 = vmatpush1.bf16.msra.mxu0 %v1744_v20  ;;  %v1546_v0 = vld [vmem:[%s2165_s2] sm:$0x3]  ;;  %881 = vperm.xlu0 %1712, %v878_v63   ;;  %v1634_v10 = vld [vmem:[%s2166_s1 + $0x6] sm:$0x3]  ;;  %v1637_v13 = vld [vmem:[%s2166_s1 + $0x2] sm:$0x3] }
  0x14   :  { %487 = vmatpush1.bf16.msra.mxu1 %v1745_v21  ;;  %447 = vmatprep.subr.bf16.mxu0 %v1746_v22  ;;  %v566_v4 = vld [vmem:[%s2166_s1] sm:$0x3]  ;;  %v1791_v14 = vld [vmem:[%s2162_s3 + $0x104] ss:$24 sps:$4 sm:$0xff]   ;;  %v1792_v17 = vld [vmem:[%s2162_s3 + $0x130] ss:$24 sps:$4 sm:$0xff]  }
  0x15   :  { %488 = vmatprep.subr.bf16.mxu1 %v1748_v23  ;;  %1549 = vperm.xlu1 %1714, %v1546_v0   ;;  %v1212_v8 = vld [vmem:[%s2165_s2] sm:$0x3]  ;;  %v1639_v16 = vld [vmem:[%s2166_s1 + $0x4] sm:$0x3]  ;;  %v1643_v18 = vld [vmem:[%s2166_s1 + $0x8] sm:$0x3] }
  0x16   :  { %v1783_v9 = vld [vmem:[%s2162_s3 + $0xa0] ss:$24 sps:$4 sm:$0xff]   ;;  %v1797_v19 = vld [vmem:[%s2162_s3 + $0x164] ss:$24 sps:$4 sm:$0xff]   ;;  %v1642_v22 = vld [vmem:[%s2166_s1 + $0xe] sm:$0x3] }
  0x17   :  { %448 = vmatpush1.bf16.msra.mxu0 %v1750_v24  ;;  %1713 = vset.pattern.permute.xlu0 %v1806_v7  ;;  %v1789_v15 = vld [vmem:[%s2162_s3 + $0x100] ss:$24 sps:$4 sm:$0xff]   ;;  %v1800_v23 = vld [vmem:[%s2162_s3 + $0x194] ss:$24 sps:$4 sm:$0xff]   ;;  %v1655_v33 = vld [vmem:[%s2166_s1 + $0x12] sm:$0x3] }
  0x18   :  { %489 = vmatpush1.bf16.msra.mxu1 %v1751_v25  ;;  %449 = vmatprep.subr.bf16.mxu0 %v1752_v26  ;;  %v80_v20 = vld [vmem:[%s2162_s3 + $0x1c0] sm:$0x11]  ;;  %v1798_v25 = vld [vmem:[%s2162_s3 + $0x190] ss:$24 sps:$4 sm:$0xff]   ;;  %v1651_v32 = vld [vmem:[%s2166_s1 + $0x16] sm:$0x3] }
  0x19   :  { %490 = vmatprep.subr.bf16.mxu1 %v1754_v27  ;;  %1215 = vperm.xlu0 %1713, %v1212_v8   ;;  %v1795_v21 = vld [vmem:[%s2162_s3 + $0x160] ss:$24 sps:$4 sm:$0xff]   ;;  %v1630_v24 = vcombine.high %v80_v20, %v80_v20  ;;  %v1646_v26 = vld [vmem:[%s2166_s1 + $0xa] sm:$0x3]  ;;  %v1629_v27 = vcombine.low %v80_v20, %v80_v20  ;;  %v1657_v34 = vld [vmem:[%s2166_s1 + $0x14] sm:$0x3] }
  0x1b   :  { %450 = vmatpush1.bf16.msra.mxu0 %v1756_v28  ;;  %v435_v28 = vand.u32 %v1630_v24, %v1956_v43 }
  0x1c   :  { %491 = vmatpush1.bf16.msra.mxu1 %v1757_v29  ;;  %451 = vmatprep.subr.bf16.mxu0 %v1758_v30  ;;  %v1648_v29 = vld [vmem:[%s2166_s1 + $0xc] sm:$0x3]  ;;  %v432_v30 = vand.u32 %v1629_v27, %v1956_v43 }
  0x1d   :  { %492 = vmatprep.subr.bf16.mxu1 %v1760_v31  ;;  %1715 = vset.pattern.permute.xlu0 %v1804_v5  ;;  %v1794_v5 = vld [vmem:[%s2162_s3 + $0x134] ss:$24 sps:$4 sm:$0xff]   ;;  %v1652_v31 = vld [vmem:[%s2166_s1 + $0x10] sm:$0x3] }
  0x1f   :  { %452 = vmatpush1.bf16.msra.mxu0 %v1762_v36  ;;  %v98_v36 = vshrl.u32 %v97_v35, 7 }
  0x20   :  { %493 = vmatpush1.bf16.msra.mxu1 %v1763_v37  ;;  %453 = vmatprep.subr.bf16.mxu0 %v1764_v38  ;;  %v95_v38 = vld [vmem:[%s2167_s4] sm:$0x3f] }
  0x21   :  { %494 = vmatprep.subr.bf16.mxu1 %v1766_v40  ;;  %v99_v37 = vsub.s32 0, %v98_v36  ;;  %v103_v41 = vsub.s32 1, %v98_v36  ;;  %v107_v51 = vsub.s32 2, %v98_v36 }
  0x23   :  { %454 = vmatpush1.bf16.msra.mxu0 %v1768_v44  ;;  %v100_v46 = vrot.slane %v95_v38, %v99_v37 }
  0x24   :  { %495 = vmatpush1.bf16.msra.mxu1 %v1769_v45  ;;  %455 = vmatprep.subr.bf16.mxu0 %v423_v48 }
  0x25   :  { %496 = vmatprep.subr.bf16.mxu1 %v429_v49  ;;  %v104_v49 = vrot.slane %v95_v38, %v103_v41 }
  0x27   :  { %456 = vmatpush1.bf16.msra.mxu0 %v420_v52 }
  0x28   :  { %497 = vmatpush1.bf16.msra.mxu1 %v426_v53  ;;  %519 = vmatprep.subr.bf16.mxu0 %v1776_v54  ;;  %v111_v53 = vsub.s32 3, %v98_v36 }
  0x29   :  { %1661 = vmatprep.subr.bf16.mxu1 %v1982_v56 }
  0x2a   :  { %470 = vmatmul.mubr.bf16.vlgmr.msra.gmra.mrb[0].mxu0 %v1987_v58 }
  0x2b   :  { %511 = vmatmul.mubr.bf16.vlgmr.msra.gmra.mrb[0].mxu1 %v1987_v58  ;;  %520 = vmatpush1.bf16.msra.mxu0 %v1774_v59  ;;  %v112_v59 = vrot.slane %v95_v38, %v111_v53 }
  0x2c   :  { %1663 = vmatpush1.bf16.msra.mxu1 %v1992_v60  ;;  %521 = vmatprep.subr.bf16.mxu0 %v1779_v61 }
  0x2d   :  { %635 = vmatprep.mubr.f32.mxu1 %v1805_v1  ;;  %1665 = vmatprep.subr.bf16.mxu1 %v1982_v56 }
  0x2e   :  { %1633 = vmatprep.mubr.msk.bf16.mxu0 %vm412_vm1, %v94_v39 }
  0x2f   :  { %522 = vmatpush1.bf16.msra.mxu0 %v1777_v62 }
  0x30   :  { %523 = vmatprep.subr.bf16.mxu0 %v1782_v2 }
  0x33   :  { %1635 = vmatmul.mubr.msk.f32.vlgmr.msra.gmra.mrb[4].mxu1 %vm567_vm2, %v566_v4  ;;  %524 = vmatpush1.bf16.msra.mxu0 %v1780_v3 }
  0x34   :  { %1667 = vmatpush1.bf16.msra.mxu1 %v1992_v60  ;;  %711 = vmatprep.mubr.f32.mxu1 %v1805_v1 }
  0x35   :  { %525 = vmatprep.subr.bf16.mxu0 %v1785_v6  ;;  %1669 = vmatprep.subr.bf16.mxu1 %v1982_v56 }
  0x37   :  { %1636 = vmatmul.mubr.msk.f32.vlgmr.msra.gmra.mrb[6].mxu1 %vm567_vm2, %v1634_v10  ;;  %526 = vmatpush1.bf16.msra.mxu0 %v1783_v9 }
  0x38   :  { %1671 = vmatpush1.bf16.msra.mxu1 %v1992_v60  ;;  %787 = vmatprep.mubr.f32.mxu1 %v1805_v1 }
  0x39   :  { %527 = vmatprep.subr.bf16.mxu0 %v1788_v11  ;;  %1673 = vmatprep.subr.bf16.mxu1 %v1982_v56 }
  0x3b   :  { %1638 = vmatmul.mubr.msk.f32.vlgmr.msra.gmra.mrb[8].mxu1 %vm567_vm2, %v1637_v13  ;;  %528 = vmatpush1.bf16.msra.mxu0 %v1786_v12 }
  0x3c   :  { %1675 = vmatpush1.bf16.msra.mxu1 %v1992_v60  ;;  %867 = vmatprep.mubr.f32.mxu1 %v1805_v1 }
  0x3d   :  { %529 = vmatprep.subr.bf16.mxu0 %v1791_v14  ;;  %1677 = vmatprep.subr.bf16.mxu1 %v1982_v56 }
  0x3f   :  { %1640 = vmatmul.mubr.msk.f32.vlgmr.msra.gmra.mrb[10].mxu1 %vm567_vm2, %v1639_v16  ;;  %530 = vmatpush1.bf16.msra.mxu0 %v1789_v15 }
  0x40   :  { %1679 = vmatpush1.bf16.msra.mxu1 %v1992_v60  ;;  %969 = vmatprep.mubr.f32.mxu1 %v1805_v1 }
  0x41   :  { %531 = vmatprep.subr.bf16.mxu0 %v1794_v5  ;;  %1681 = vmatprep.subr.bf16.mxu1 %v1982_v56 }
  0x43   :  { %1644 = vmatmul.mubr.msk.f32.vlgmr.msra.gmra.mrb[12].mxu1 %vm567_vm2, %v1643_v18  ;;  %532 = vmatpush1.bf16.msra.mxu0 %v1792_v17 }
  0x44   :  { %1683 = vmatpush1.bf16.msra.mxu1 %v1992_v60  ;;  %1045 = vmatprep.mubr.f32.mxu1 %v1805_v1 }
  0x45   :  { %533 = vmatprep.subr.bf16.mxu0 %v1797_v19  ;;  %1685 = vmatprep.subr.bf16.mxu1 %v1982_v56 }
  0x47   :  { %1645 = vmatmul.mubr.msk.f32.vlgmr.msra.gmra.mrb[14].mxu1 %vm567_vm2, %v1642_v22  ;;  %534 = vmatpush1.bf16.msra.mxu0 %v1795_v21  ;;  %v115_v21 = vsub.s32 4, %v98_v36 }
  0x48   :  { %1687 = vmatpush1.bf16.msra.mxu1 %v1992_v60  ;;  %1121 = vmatprep.mubr.f32.mxu1 %v1805_v1 }
  0x49   :  { %535 = vmatprep.subr.bf16.mxu0 %v1800_v23  ;;  %1689 = vmatprep.subr.bf16.mxu1 %v1982_v56  ;;  %v119_v23 = vsub.s32 5, %v98_v36 }
  0x4b   :  { %1647 = vmatmul.mubr.msk.f32.vlgmr.msra.gmra.mrb[16].mxu1 %vm567_vm2, %v1646_v26  ;;  %536 = vmatpush1.bf16.msra.mxu0 %v1798_v25 }
  0x4c   :  { %1691 = vmatpush1.bf16.msra.mxu1 %v1992_v60  ;;  %1201 = vmatprep.mubr.f32.mxu1 %v1805_v1 }
  0x4d   :  { %537 = vmatprep.subr.bf16.mxu0 %v435_v28  ;;  %1693 = vmatprep.subr.bf16.mxu1 %v1982_v56  ;;  %v116_v28 = vrot.slane %v95_v38, %v115_v21 }
  0x4f   :  { %1649 = vmatmul.mubr.msk.f32.vlgmr.msra.gmra.mrb[18].mxu1 %vm567_vm2, %v1648_v29  ;;  %538 = vmatpush1.bf16.msra.mxu0 %v432_v30  ;;  %v120_v29 = vrot.slane %v95_v38, %v119_v23 }
  0x50   :  { %1695 = vmatpush1.bf16.msra.mxu1 %v1992_v60  ;;  %1303 = vmatprep.mubr.f32.mxu1 %v1805_v1 }
  0x51   :  { %1697 = vmatprep.subr.bf16.mxu1 %v1982_v56  ;;  %1701 = vmatprep.subr.bf16.mxu0 %v1982_v56 }
  0x52   :  { %552 = vmatmul.mubr.bf16.vlgmr.msra.gmra.mrb[4].mxu0 %v1987_v58  ;;  %v108_v58 = vrot.slane %v95_v38, %v107_v51 }
  0x53   :  { %1653 = vmatmul.mubr.msk.f32.vlgmr.msra.gmra.mrb[20].mxu1 %vm567_vm2, %v1652_v31  ;;  %1703 = vmatpush1.bf16.msra.mxu0 %v1992_v60 }
  0x54   :  { %1699 = vmatpush1.bf16.msra.mxu1 %v1992_v60  ;;  %1379 = vmatprep.mubr.f32.mxu1 %v1805_v1 }
  0x55   :  { %1705 = vmatprep.subr.bf16.mxu1 %v1982_v56  ;;  %1455 = vmatprep.mubr.f32.mxu0 %v1805_v1 }
  0x57   :  { %1654 = vmatmul.mubr.msk.f32.vlgmr.msra.gmra.mrb[22].mxu1 %vm567_vm2, %v1651_v32 }
  0x58   :  { %1707 = vmatpush1.bf16.msra.mxu1 %v1992_v60  ;;  %1535 = vmatprep.mubr.f32.mxu1 %v1805_v1 }
  0x5a   :  { %1656 = vmatmul.mubr.msk.f32.vlgmr.msra.gmra.mrb[8].mxu0 %vm567_vm2, %v1655_v33 }
  0x5b   :  { %1658 = vmatmul.mubr.msk.f32.vlgmr.msra.gmra.mrb[24].mxu1 %vm567_vm2, %v1657_v34 }
  0x92   :  { %v882_v30 = vpop.permute.xlu0 %881 }
  0xfd   :  { %v471_v39 = vpop.f32.mrb[0].mxu0 }
  0xfe   :  { %v512_v40 = vpop.f32.mrb[0].mxu1  ;;  %v473_v42 = vpop.f32.mrb[1].mxu0  ;;  %v472_v50 = vadd.f32 %v471_v39, %v100_v46 }
  0xff   :  { %v514_v43 = vpop.f32.mrb[1].mxu1  ;;  %v475_v44 = vpop.f32.mrb[2].mxu0  ;;  %v474_v52 = vadd.f32 %v473_v42, %v104_v49  ;;  %v513_v0 = vadd.f32 %v512_v40, %v108_v58 }
 0x100   :  { %v516_v45 = vpop.f32.mrb[2].mxu1  ;;  %v476_v47 = vpop.f32.mrb[3].mxu0  ;;  %v2148_v1 = vadd.f32 %v514_v43, %v112_v59 }
 0x101   :  { %v517_v48 = vpop.f32.mrb[3].mxu1  ;;  %v1216_v46 = vpop.permute.xlu0 %1215 }
 0x106   :  { %v637_v54 = vpop.f32.mrb[4].mxu1 }
 0x107   :  { %v642_v55 = vmul.f32 %v637_v54, %v472_v50  ;;  %v639_v56 = vpop.f32.mrb[5].mxu1 }
 0x108   :  { %v643_v57 = vmul.f32 %v639_v56, %v474_v52 }
 0x10a   :  { %v713_v60 = vpop.f32.mrb[6].mxu1 }
 0x10b   :  { %v714_v61 = vadd.f32 %v713_v60, %v642_v55  ;;  %v715_v62 = vpop.f32.mrb[7].mxu1 }
 0x10c   :  { %v716_v63 = vadd.f32 %v715_v62, %v643_v57 }
 0x10e   :  { %v789_v2 = vpop.f32.mrb[8].mxu1 }
 0x10f   :  { %v794_v3 = vmul.f32 %v789_v2, %v513_v0  ;;  %v791_v4 = vpop.f32.mrb[9].mxu1 }
 0x110   :  { %v795_v6 = vmul.f32 %v791_v4, %v2148_v1 }
 0x111   :  { %v796_v7 = vadd.f32 %v794_v3, %v714_v61 }
 0x112   :  { %v797_v8 = vadd.f32 %v795_v6, %v716_v63  ;;  %v869_v9 = vpop.f32.mrb[10].mxu1 }
 0x113   :  { %v871_v10 = vpop.f32.mrb[11].mxu1 }
 0x116   :  { %v971_v11 = vpop.f32.mrb[12].mxu1 }
 0x117   :  { %v976_v12 = vmul.f32 %v971_v11, %v472_v50  ;;  %v973_v13 = vpop.f32.mrb[13].mxu1 }
 0x118   :  { %v977_v14 = vmul.f32 %v973_v13, %v474_v52 }
 0x11a   :  { %v1047_v15 = vpop.f32.mrb[14].mxu1 }
 0x11b   :  { %v1048_v16 = vadd.f32 %v1047_v15, %v976_v12  ;;  %v1049_v5 = vpop.f32.mrb[15].mxu1 }
 0x11c   :  { %v1050_v17 = vadd.f32 %v1049_v5, %v977_v14 }
 0x11e   :  { %v1123_v18 = vpop.f32.mrb[16].mxu1 }
 0x11f   :  { %v1128_v19 = vmul.f32 %v1123_v18, %v513_v0  ;;  %v1125_v20 = vpop.f32.mrb[17].mxu1 }
 0x120   :  { %v1129_v22 = vmul.f32 %v1125_v20, %v2148_v1 }
 0x121   :  { %v1130_v24 = vadd.f32 %v1128_v19, %v1048_v16 }
 0x122   :  { %v1131_v25 = vadd.f32 %v1129_v22, %v1050_v17  ;;  %v1203_v26 = vpop.f32.mrb[18].mxu1 }
 0x123   :  { %v1205_v27 = vpop.f32.mrb[19].mxu1 }
 0x125   :  { %v553_v31 = vpop.f32.mrb[4].mxu0 }
 0x126   :  { %v1305_v32 = vpop.f32.mrb[20].mxu1  ;;  %v554_v33 = vadd.f32 %v553_v31, %v116_v28  ;;  %v555_v35 = vpop.f32.mrb[5].mxu0 }
 0x127   :  { %v1310_v34 = vmul.f32 %v1305_v32, %v472_v50  ;;  %v1307_v37 = vpop.f32.mrb[21].mxu1  ;;  %v556_v39 = vadd.f32 %v555_v35, %v120_v29  ;;  %v557_v41 = vpop.f32.mrb[6].mxu0 }
 0x128   :  { %v1311_v40 = vmul.f32 %v1307_v37, %v474_v52  ;;  %v874_v42 = vmul.f32 %v869_v9, %v554_v33  ;;  %v558_v43 = vpop.f32.mrb[7].mxu0  ;;  %v1208_v44 = vmul.f32 %v1203_v26, %v554_v33  ;;  %v1550_v9 = vpop.permute.xlu1 %1549 }
 0x129   :  { %v875_v36 = vmul.f32 %v871_v10, %v556_v39  ;;  %v1209_v47 = vmul.f32 %v1205_v27, %v556_v39 }
 0x12a   :  { %v1381_v45 = vpop.f32.mrb[22].mxu1  ;;  %v876_v48 = vadd.f32 %v874_v42, %v796_v7  ;;  %v1210_v51 = vadd.f32 %v1208_v44, %v1130_v24 }
 0x12b   :  { %v1382_v49 = vadd.f32 %v1381_v45, %v1310_v34  ;;  %v1383_v38 = vpop.f32.mrb[23].mxu1  ;;  %v877_v53 = vadd.f32 %v875_v36, %v797_v8  ;;  %v1211_v55 = vadd.f32 %v1209_v47, %v1131_v25 }
 0x12c   :  { %v1384_v54 = vadd.f32 %v1383_v38, %v1311_v40  ;;  %v884_v50 = vadd.f32 %v882_v30, %v876_v48  ;;  %v1218_v56 = vadd.f32 %v1216_v46, %v1210_v51 }
 0x12d   :  { %v885_v57 = vadd.f32 %v882_v30, %v877_v53  ;;  %v1219_v58 = vadd.f32 %v1216_v46, %v1211_v55  ;;  %v1457_v52 = vpop.f32.mrb[8].mxu0 }
 0x12e   :  { %v1537_v59 = vpop.f32.mrb[24].mxu1  ;;  %v1462_v60 = vmul.f32 %v1457_v52, %v513_v0  ;;  %v1459_v62 = vpop.f32.mrb[9].mxu0 }
 0x12f   :  { %v1542_v61 = vmul.f32 %v1537_v59, %v554_v33  ;;  %v1539_v63 = vpop.f32.mrb[25].mxu1  ;;  %v888_v2 = vcombine.low %v884_v50, %v885_v57  ;;  %v1222_v3 = vcombine.low %v1218_v56, %v1219_v58  ;;  %v1463_v4 = vmul.f32 %v1459_v62, %v2148_v1 }
 0x130   :  { %v1543_v6 = vmul.f32 %v1539_v63, %v556_v39  ;;  %v1464_v7 = vadd.f32 %v1462_v60, %v1382_v49 }
 0x131   :  { %1641 = vst.sshfl [vmem:[%s2168_s6] sm:$0x33 pattern:$0x76325410] %v888_v2  ;;  %v1465_v8 = vadd.f32 %v1463_v4, %v1384_v54 }
 0x132   :  { %1650 = vst.sshfl [vmem:[%s2168_s6 + $0x4] sm:$0x33 pattern:$0x76325410] %v1222_v3  ;;  %v1544_v0 = vadd.f32 %v1542_v61, %v1464_v7 }
 0x133   :  { %v1545_v10 = vadd.f32 %v1543_v6, %v1465_v8 }
 0x134   :  { %v1552_v11 = vadd.f32 %v1550_v9, %v1544_v0 }
 0x135   :  { %v1553_v12 = vadd.f32 %v1550_v9, %v1545_v10 }
 0x137   :  { %v1556_v13 = vcombine.low %v1552_v11, %v1553_v12 }
 0x139   :  { %1659 = vst.sshfl [vmem:[%s2168_s6 + $0x8] sm:$0x33 pattern:$0x76325410] %v1556_v13 }

</bundles_post_ra>
